<compile_context>
chip_gen: v6e
topology: v6e:2x2x1
jax: 0.10.0
libtpu: 0.0.40
codegen_flags: <defaults>
</compile_context>

<pallas_src>
import functools

import numpy as np
import jax
import jax.numpy as jnp
from jax import lax
from jax.experimental import pallas as pl
from jax.experimental.pallas import tpu as pltpu

NBINS = 256      # skimage.filters.threshold_otsu default
MEAN = 0.5       # thershold_mask defaults
STD = 0.5


# -----------------------------------------------------------------------------
# Separable gaussian-blur weights (skimage 'nearest' boundary, sigma=1.0).
# -----------------------------------------------------------------------------
def _gaussian_kernel_1d(sigma=1.0, truncate=4.0):
    radius = int(truncate * sigma + 0.5)
    x = np.arange(-radius, radius + 1, dtype=np.float64)
    k = np.exp(-0.5 * (x / sigma) ** 2)
    return k / k.sum()


def _blur_matrix(n, sigma=1.0):
    # Dense n x n matrix equivalent to the 1-D gaussian filter with edge
    # replication ('nearest'), as used by skimage.filters.gaussian.
    k = _gaussian_kernel_1d(sigma)
    r = (len(k) - 1) // 2
    m = np.zeros((n, n), dtype=np.float64)
    for i in range(n):
        for d in range(-r, r + 1):
            p = min(max(i + d, 0), n - 1)
            m[i, p] += k[d + r]
    return m


@functools.lru_cache(maxsize=None)
def _blur_weights(h, w, sigma=1.0):
    # blurred = Mh @ G @ Mw^T
    mh = jnp.asarray(_blur_matrix(h, sigma), dtype=jnp.float32)
    mwt = jnp.asarray(_blur_matrix(w, sigma).T, dtype=jnp.float32)
    return mh, mwt


# -----------------------------------------------------------------------------
# Kernel 1: denormalize + clamp + separable gaussian blur (batched matmuls)
# -----------------------------------------------------------------------------
def _blur_kernel(x_ref, mh_ref, mwt_ref, o_ref):
    bt, h, w = o_ref.shape
    # cast from the input dtype inside the kernel (no wrapper-level cast)
    g = jnp.clip(x_ref[:, 0].astype(jnp.float32) * STD + MEAN, 0.0, 1.0)  # (bt,h,w)
    # W-side: ONE matmul with M = bt*h (the reshape is free when h % 8 == 0);
    # default precision (no Precision.HIGHEST), f32 accumulation.
    t = jnp.dot(g.reshape(bt * h, w), mwt_ref[...],
                preferred_element_type=jnp.float32).reshape(bt, h, w)
    # H-side: a single batched dot_general, mh broadcast across the bt images.
    mh_b = jnp.broadcast_to(mh_ref[...][None], (bt, h, h))
    o_ref[...] = lax.dot_general(
        mh_b, t, dimension_numbers=(((2,), (1,)), ((0,), (0,))),
        preferred_element_type=jnp.float32)


# -----------------------------------------------------------------------------
# Kernel 2: Otsu threshold (chunked VPU histogram) + soft mask + rgba2rgb blend
# -----------------------------------------------------------------------------
def _otsu_mask_kernel(blur_ref, x_ref, o_ref, *, c, hw, chunk, use_thermal):
    row = blur_ref[0]                                           # (1, hw) f32
    vmin = jnp.min(row, axis=1, keepdims=True)                  # (1, 1)
    vmax = jnp.max(row, axis=1, keepdims=True)
    rng = vmax - vmin
    width = jnp.where(rng > 0.0, rng, 1.0) * (1.0 / NBINS)      # (1, 1)
    inv_width = 1.0 / width

    bins_col = lax.broadcasted_iota(jnp.int32, (NBINS, 1), 0).astype(jnp.float32)
    bins_row = lax.broadcasted_iota(jnp.int32, (1, NBINS - 1), 1).astype(jnp.float32)

    def hist_chunk(seg):                                        # seg: (1, L)
        # per-pixel 256-bin index (integral float); values at vmax -> bin 255
        bidx = jnp.clip(jnp.floor((seg - vmin) * inv_width), 0.0, NBINS - 1.0)
        eq = (bidx == bins_col).astype(jnp.float32)             # (256, L) on the VPU
        return jnp.sum(eq, axis=1, keepdims=True)               # (256, 1)

    n_full = hw // chunk
    rem = hw - n_full * chunk
    counts = jnp.zeros((NBINS, 1), jnp.float32)
    if n_full > 0:
        def body(k, acc):
            start = pl.multiple_of(k * chunk, chunk)            # lane-tile aligned
            return acc + hist_chunk(blur_ref[0, :, pl.ds(start, chunk)])
        counts = lax.fori_loop(0, n_full, body, counts)
    if rem > 0:
        counts = counts + hist_chunk(blur_ref[0, :, n_full * chunk:])

    # Otsu cumulants from the 256-bin histogram: tiny (256, 255) masked reduces.
    le = (bins_col <= bins_row).astype(jnp.float32)             # (256, 255): j <= i
    weight1 = jnp.sum(counts * le, axis=0, keepdims=True)       # (1, 255)
    sumb1 = jnp.sum((counts * bins_col) * le, axis=0, keepdims=True)
    total_b = jnp.sum(counts * bins_col, axis=0, keepdims=True)  # (1, 1)
    weight2 = float(hw) - weight1
    sumb2 = total_b - sumb1
    r1 = sumb1 / jnp.maximum(weight1, 1.0)
    r2 = sumb2 / jnp.maximum(weight2, 1.0)
    dmean = (r1 - r2) * width                                   # == mean1 - mean2
    var12 = weight1 * weight2 * dmean * dmean                   # (1, 255)
    centers = vmin + (bins_row + 0.5) * width                   # bin centers
    maxvar = jnp.max(var12, axis=1, keepdims=True)
    # argmax with first-index tie-break == smallest candidate among the ties
    thresh = jnp.min(jnp.where(var12 == maxvar, centers, jnp.inf),
                     axis=1, keepdims=True)
    thresh = jnp.where(rng > 0.0, thresh, vmin)                 # constant-image guard

    # soft mask + rgba2rgb alpha blend over a white background
    mask = jnp.where(row > thresh, 1.0, row)                    # (1, hw)
    rgb = x_ref[0, c - 3:c, :].astype(jnp.float32)              # (3, hw)
    blended = jnp.clip(rgb * mask + (1.0 - mask), 0.0, 1.0)
    if use_thermal:
        if c > 3:  # pass the leading (non-RGB) channels through unchanged
            o_ref[0, :c - 3, :] = x_ref[0, :c - 3, :].astype(jnp.float32)
        o_ref[0, c - 3:, :] = blended
    else:
        o_ref[0] = blended


# -----------------------------------------------------------------------------
# Wrapper
# -----------------------------------------------------------------------------
def mask_layer(x, use_thermal=False):
    b, c, h, w = x.shape
    hw = h * w
    mh, mwt = _blur_weights(h, w, 1.0)

    # Stage-1 batch tile: largest divisor of b within a conservative VMEM budget
    # (x/out blocks, intermediates and the broadcast mh per image), capped at 8.
    per_img = (6 * h * w + h * h) * 4
    bt_cap = int(max(1, min(8, (8 * 1024 * 1024) // per_img)))
    bt1 = max(d for d in range(1, min(b, bt_cap) + 1) if b % d == 0)

    blurred = pl.pallas_call(
        _blur_kernel,
        out_shape=jax.ShapeDtypeStruct((b, h, w), jnp.float32),
        grid=(b // bt1,),
        in_specs=[
            # read only the thermal channel straight out of x (no wrapper slice)
            pl.BlockSpec((bt1, 1, h, w), lambda i: (i, 0, 0, 0)),
            pl.BlockSpec((h, h), lambda i: (0, 0)),
            pl.BlockSpec((w, w), lambda i: (0, 0)),
        ],
        out_specs=pl.BlockSpec((bt1, h, w), lambda i: (i, 0, 0)),
        compiler_params=pltpu.CompilerParams(dimension_semantics=("parallel",)),
    )(x, mh, mwt)

    # bitcast-level reshapes into the lane-major flat layout (no pads, no casts)
    blurred2 = blurred.reshape(b, 1, hw)
    x2 = x.reshape(b, c, hw)
    c_out = c if use_thermal else 3

    # histogram chunk: ~1K lanes, lane-tile aligned; small images use one chunk
    chunk = min(1024, (hw // 128) * 128) if hw >= 128 else hw

    kernel2 = functools.partial(_otsu_mask_kernel, c=c, hw=hw, chunk=chunk,
                                use_thermal=use_thermal)
    out = pl.pallas_call(
        kernel2,
        out_shape=jax.ShapeDtypeStruct((b, c_out, hw), jnp.float32),
        grid=(b,),
        in_specs=[
            pl.BlockSpec((1, 1, hw), lambda i: (i, 0, 0)),
            pl.BlockSpec((1, c, hw), lambda i: (i, 0, 0)),
        ],
        out_specs=pl.BlockSpec((1, c_out, hw), lambda i: (i, 0, 0)),
        compiler_params=pltpu.CompilerParams(dimension_semantics=("parallel",)),
    )(blurred2, x2)

    return out.reshape(b, c_out, h, w)


if __name__ == "__main__":
    key = jax.random.PRNGKey(0)
    B, C, H, W = 2, 4, 16, 16
    x = jax.random.normal(key, (B, C, H, W), dtype=jnp.float32)

    out = jax.block_until_ready(mask_layer(x, use_thermal=False))
    assert out.shape == (B, 3, H, W) and out.dtype == jnp.float32

    out_t = jax.block_until_ready(mask_layer(x, use_thermal=True))
    assert out_t.shape == (B, C, H, W) and out_t.dtype == jnp.float32

    print("KERNEL_OK")
</pallas_src>

<mosaic_0001>
module attributes {stable_mosaic.version = 11 : i64} {
  func.func @_blur_kernel(%arg0: i32, %arg1: memref<2x1x16x16xf32, #tpu.memory_space<vmem>>, %arg2: memref<16x16xf32, #tpu.memory_space<vmem>>, %arg3: memref<16x16xf32, #tpu.memory_space<vmem>>, %arg4: memref<2x16x16xf32, #tpu.memory_space<vmem>>) attributes {dimension_semantics = [#tpu.dimension_semantics<parallel>], iteration_bounds = array<i64: 1>, scalar_prefetch = 0 : i64, scratch_operands = 0 : i64, tpu.core_type = #tpu.core_type<tc>, window_params = [{transform_indices = @transform_0, window_bounds = array<i64: 2, 1, 16, 16>}, {pipeline_mode = #tpu.pipeline_mode<synchronous>, transform_indices = @transform_1, window_bounds = array<i64: 16, 16>}, {pipeline_mode = #tpu.pipeline_mode<synchronous>, transform_indices = @transform_2, window_bounds = array<i64: 16, 16>}, {transform_indices = @transform_3, window_bounds = array<i64: 2, 16, 16>}]} {
    %c0 = arith.constant 0 : index
    %c0_0 = arith.constant 0 : index
    %c0_1 = arith.constant 0 : index
    %c0_2 = arith.constant 0 : index
    %0 = vector.load %arg1[%c0, %c0_0, %c0_1, %c0_2] : memref<2x1x16x16xf32, #tpu.memory_space<vmem>>, vector<2x1x16x16xf32>
    %1 = vector.shape_cast %0 : vector<2x1x16x16xf32> to vector<2x16x16xf32>
    %cst = arith.constant 5.000000e-01 : f32
    %2 = vector.broadcast %cst : f32 to vector<2x16x16xf32>
    %3 = arith.mulf %1, %2 : vector<2x16x16xf32>
    %cst_3 = arith.constant 5.000000e-01 : f32
    %4 = vector.broadcast %cst_3 : f32 to vector<2x16x16xf32>
    %5 = arith.addf %3, %4 : vector<2x16x16xf32>
    %cst_4 = arith.constant 0.000000e+00 : f32
    %cst_5 = arith.constant 1.000000e+00 : f32
    %6 = vector.broadcast %cst_4 : f32 to vector<2x16x16xf32>
    %7 = arith.maximumf %6, %5 : vector<2x16x16xf32>
    %8 = vector.broadcast %cst_5 : f32 to vector<2x16x16xf32>
    %9 = arith.minimumf %8, %7 : vector<2x16x16xf32>
    %10 = vector.shape_cast %9 : vector<2x16x16xf32> to vector<32x16xf32>
    %c0_6 = arith.constant 0 : index
    %c0_7 = arith.constant 0 : index
    %11 = vector.load %arg3[%c0_6, %c0_7] : memref<16x16xf32, #tpu.memory_space<vmem>>, vector<16x16xf32>
    %cst_8 = arith.constant dense<0.000000e+00> : vector<32x16xf32>
    %12 = tpu.matmul %10, %11, %cst_8 {dimension_numbers = #tpu.dot_dimension_numbers<[1], [0], [0], [1], [0, 0, 1, 1], [], []>} : vector<32x16xf32>, vector<16x16xf32>, vector<32x16xf32> -> vector<32x16xf32>
    %13 = vector.shape_cast %12 : vector<32x16xf32> to vector<2x16x16xf32>
    %c0_9 = arith.constant 0 : index
    %c0_10 = arith.constant 0 : index
    %14 = vector.load %arg2[%c0_9, %c0_10] : memref<16x16xf32, #tpu.memory_space<vmem>>, vector<16x16xf32>
    %15 = vector.shape_cast %14 : vector<16x16xf32> to vector<1x16x16xf32>
    %16 = vector.shape_cast %15 : vector<1x16x16xf32> to vector<1x16x16xf32>
    %17 = vector.broadcast %16 : vector<1x16x16xf32> to vector<2x16x16xf32>
    %cst_11 = arith.constant dense<0.000000e+00> : vector<2x16x16xf32>
    %18 = tpu.matmul %17, %13, %cst_11 {dimension_numbers = #tpu.dot_dimension_numbers<[2], [1], [1], [2], [0, 0, 0, 1, 1, 2], [0], [0]>} : vector<2x16x16xf32>, vector<2x16x16xf32>, vector<2x16x16xf32> -> vector<2x16x16xf32>
    %c0_12 = arith.constant 0 : index
    %c0_13 = arith.constant 0 : index
    %c0_14 = arith.constant 0 : index
    %19 = vector.load %arg4[%c0_12, %c0_13, %c0_14] : memref<2x16x16xf32, #tpu.memory_space<vmem>>, vector<2x16x16xf32>
    tpu.vector_store %arg4[%c0_12, %c0_13, %c0_14], %18 {strides = array<i32>} : memref<2x16x16xf32, #tpu.memory_space<vmem>>, vector<2x16x16xf32>,
    return
  }
  func.func @transform_0(%arg0: i32) -> (i32, i32, i32, i32) {
    %c0_i32 = arith.constant 0 : i32
    %c0_i32_0 = arith.constant 0 : i32
    %c0_i32_1 = arith.constant 0 : i32
    %c0_i32_2 = arith.constant 0 : i32
    return %arg0, %c0_i32, %c0_i32_0, %c0_i32_1 : i32, i32, i32, i32
  }
  func.func @transform_1(%arg0: i32) -> (i32, i32) {
    %c0_i32 = arith.constant 0 : i32
    %c0_i32_0 = arith.constant 0 : i32
    %c0_i32_1 = arith.constant 0 : i32
    return %c0_i32, %c0_i32_0 : i32, i32
  }
  func.func @transform_2(%arg0: i32) -> (i32, i32) {
    %c0_i32 = arith.constant 0 : i32
    %c0_i32_0 = arith.constant 0 : i32
    %c0_i32_1 = arith.constant 0 : i32
    return %c0_i32, %c0_i32_0 : i32, i32
  }
  func.func @transform_3(%arg0: i32) -> (i32, i32, i32) {
    %c0_i32 = arith.constant 0 : i32
    %c0_i32_0 = arith.constant 0 : i32
    %c0_i32_1 = arith.constant 0 : i32
    return %arg0, %c0_i32, %c0_i32_0 : i32, i32, i32
  }
}

</mosaic_0001>

<bundles_post_ra>
// kernel: tpu_custom_call.1
= control target key start
LH: loop header
LB: loop body
LE: loop exit
PB: predicated region body
PF: predicated region fallthrough
CT: control target
= control target key end

     0   :  { %8 = vsyncpa [#allocation3], 0  ;;  %s574_s0 = inlined_call_operand.hbm [shape: f32[2,4,16,16], index: 0, kind: input, shape index: {}]   ;;  %s575_s1 = inlined_call_operand.hbm [shape: f32[16,16], index: 1, kind: input, shape index: {}]   ;;  %s576_s2 = inlined_call_operand.hbm [shape: f32[16,16], index: 2, kind: input, shape index: {}]   ;;  %s577_s3 = inlined_call_operand.hbm [shape: f32[2,16,16], index: 3, kind: output, shape index: {}]  }
   0x1   :  { %9 = vsyncpa [#allocation6], 0 }
   0x2   :  { %10 = vsyncpa [#allocation4], 0 }
   0x3   :  { %s20_s12 = sld [smem:[#allocation0]]   ;;  %s508_s13 = smov [#allocation2]  }
   0x4   :  { %s28_s14 = sshll.u32 %s508_s13, 4  ;;  %s509_s15 = smov 1024   ;;  %s29_s14 = int_to_ptr.vmem [resolvable:$true] %s28_s14 }
   0x5   :  { %35 = sst [smem:[#allocation10]] %s509_s15  ;;  %s510_s16 = smov 256  }
   0x6   :  { %37 = sst [smem:[#allocation10 + $0x1]] %s510_s16  ;;  %s511_s17 = smov 2  }
   0x7   :  { %39 = sst [smem:[#allocation10 + $0x2]] %s511_s17  ;;  %s512_s19 = smov 128  }
   0x8   :  { %41 = sst [smem:[#allocation10 + $0x3]] %s512_s19  ;;  %s513_s21 = smov 8  }
   0x9   :  { %s381_s18 = sshll.u32 %s20_s12, 26  ;;  %43 = sst [smem:[#allocation10 + $0x4]] %s512_s19 }
   0xa   :  { %s382_s20 = sadd.s32 134217728, %s381_s18  ;;  %45 = sst [smem:[#allocation10 + $0x5]] %s513_s21 }
   0xb   :  { %s514_s22 = smov [#allocation3]   ;;  %s515_s23 = smov 131072  }
   0xc   :  { %47 = dma.general %s574_s0, 512, %s29_s14, %s514_s22, %s515_s23, [#allocation10], %s382_s20, 0  }
   0xd   :  { %s516_s26 = smov [#allocation5]  }
   0xe   :  { %s53_s27 = sshll.u32 %s516_s26, 4  ;;  %s54_s27 = int_to_ptr.vmem [resolvable:$true] %s53_s27 }
   0xf   :  { %s450_s28 = scalar_lea.vmem %s54_s27, 256  ;;  %p455_p1 = scmp.lt.s32.totalorder %s54_s27, %s54_s27 }
  0x10   :  { %p451_p0 = scmp.ne.s32.totalorder %s54_s27, %s450_s28  ;;  %p456_p2 = scmp.lt.s32.totalorder %s450_s28, %s450_s28 }
  0x12   :  { %p457_p3 = por %p456_p2, %p455_p1 }
  0x14   :  { %p458_p4 = pnand %p457_p3, %p451_p0 }
  0x16   :  { %461 = shalt.err (!%p458_p4)
}
  0x17   :  { %s517_s29 = smov 128   ;;  %s518_s30 = smov 8  }
  0x18   :  { %59 = dma.hbm_to_vmem [thread:$0]  %s575_s1, 256, %s54_s27, [#allocation6], %s517_s29, %s517_s29, %s518_s30  }
  0x19   :  { %s519_s0 = smov [#allocation7]  }
  0x1a   :  { %s65_s6 = sshll.u32 %s519_s0, 4  ;;  %s66_s6 = int_to_ptr.vmem [resolvable:$true] %s65_s6 }
  0x1b   :  { %s470_s7 = scalar_lea.vmem %s66_s6, 256  ;;  %p475_p6 = scmp.lt.s32.totalorder %s66_s6, %s66_s6 }
  0x1c   :  { %p471_p5 = scmp.ne.s32.totalorder %s66_s6, %s470_s7  ;;  %p476_p7 = scmp.lt.s32.totalorder %s470_s7, %s470_s7 }
  0x1e   :  { %p477_p8 = por %p476_p7, %p475_p6 }
  0x20   :  { %p478_p9 = pnand %p477_p8, %p471_p5 }
  0x22   :  { %481 = shalt.err (!%p478_p9)
}
  0x23   :  { %71 = dma.hbm_to_vmem [thread:$0]  %s576_s2, 256, %s66_s6, [#allocation6], %s517_s29, %s517_s29, %s518_s30  }
  0x24   :  { %502 = dma.done.wait [#allocation3], 512  }
  0x25   :  { %503 = vsyncadd [#allocation3], 4294966784 }
  0x26   :  { %504 = dma.done.wait [#allocation6], 512  }
  0x27   :  { %505 = vsyncadd [#allocation6], 4294966784  ;;  %v102_v0 = vld [vmem:[#allocation7 + $0x8] sm:$0xff]  ;;  %v101_v1 = vld [vmem:[#allocation7] sm:$0xff]  ;;  %vm103_vm0 = vcmask 130048   ;;  %s520_s1 = smov [#allocation8]  }
  0x28   :  { %v81_v2 = vld [vmem:[#allocation2] sm:$0xff]  ;;  %405 = vmatprep.subr.mxu0 %v102_v0  ;;  %v82_v4 = vld [vmem:[#allocation2 + $0x8] sm:$0xff]  ;;  %v83_v5 = vld [vmem:[#allocation2 + $0x10] sm:$0xff]  ;;  %s368_s2 = sshll.u32 %s520_s1, 4  ;;  %s369_s2 = int_to_ptr.vmem [resolvable:$true] %s368_s2 }
  0x29   :  { %v85_v3 = vmul.f32 0.5, %v81_v2  ;;  %v84_v6 = vld [vmem:[#allocation2 + $0x18] sm:$0xff]  ;;  %406 = vmatpush3.msra.mxu0 %v102_v0  ;;  %v86_v7 = vmul.f32 0.5, %v82_v4  ;;  %v87_v8 = vmul.f32 0.5, %v83_v5  ;;  %v201_v22 = vld [vmem:[#allocation5] sm:$0xff]  ;;  %v202_v25 = vld [vmem:[#allocation5 + $0x8] sm:$0xff]  ;;  %p487_p11 = scmp.lt.s32.totalorder %s369_s2, %s369_s2 }
  0x2a   :  { %v88_v9 = vmul.f32 0.5, %v84_v6  ;;  %407 = vmatprep.subr.mxu0 %v101_v1  ;;  %419 = vmatprep.mubr.msk.f32.mxu1 %vm103_vm0, %v201_v22  ;;  %s482_s10 = scalar_lea.vmem %s369_s2, 512 }
  0x2b   :  { %v89_v10 = vadd.f32 0.5, %v85_v3  ;;  %408 = vmatpush3.msra.mxu0 %v101_v1  ;;  %v90_v11 = vadd.f32 0.5, %v86_v7  ;;  %v91_v12 = vadd.f32 0.5, %v87_v8  ;;  %p483_p10 = scmp.ne.s32.totalorder %s369_s2, %s482_s10  ;;  %p488_p12 = scmp.lt.s32.totalorder %s482_s10, %s482_s10 }
  0x2c   :  { %v92_v13 = vadd.f32 0.5, %v88_v9 }
  0x2d   :  { %v93_v14 = vmax.f32 %v89_v10, 0.0  ;;  %v94_v15 = vmax.f32 %v90_v11, 0.0  ;;  %v95_v16 = vmax.f32 %v91_v12, 0.0  ;;  %p489_p13 = por %p488_p12, %p487_p11 }
  0x2e   :  { %v96_v17 = vmax.f32 %v92_v13, 0.0 }
  0x2f   :  { %v97_v18 = vmin.f32 %v93_v14, 1.0  ;;  %v98_v19 = vmin.f32 %v94_v15, 1.0  ;;  %v99_v20 = vmin.f32 %v95_v16, 1.0  ;;  %p490_p0 = pnand %p489_p13, %p483_p10 }
  0x30   :  { %v100_v21 = vmin.f32 %v96_v17, 1.0 }
  0x31   :  { %409 = vmatprep.mubr.msk.f32.mxu0 %vm103_vm0, %v97_v18 }
  0x32   :  { %410 = vmatmul.mubr.msk.f32.vlgmr.msra.gmra.mxu0 %vm103_vm0, %v98_v19 }
  0x33   :  { %412 = vmatprep.mubr.msk.f32.mxu0 %vm103_vm0, %v99_v20 }
  0x36   :  { %413 = vmatmul.mubr.msk.f32.gmra.mxu0 %vm103_vm0, %v100_v21 }
  0xf2   :  { %v411_v23 = vpop.f32.mrf.mxu0 }
  0xf3   :  { %415 = vmatprep.subr.mxu1 %v411_v23 }
  0xf4   :  { %v182_v24 = vpop.f32.mrf.mxu0  ;;  %416 = vmatpush3.msra.mxu1 %v411_v23 }
  0xf5   :  { %417 = vmatprep.subr.mxu1 %v182_v24 }
  0xf6   :  { %v414_v26 = vpop.f32.mrf.mxu0  ;;  %418 = vmatpush3.msra.mxu1 %v182_v24 }
  0xf7   :  { %420 = vmatmul.mubr.msk.f32.vlgmr.msra.gmra.mxu1 %vm103_vm0, %v202_v25  ;;  %422 = vmatprep.subr.mxu1 %v414_v26 }
  0xf8   :  { %v192_v27 = vpop.f32.mrf.mxu0  ;;  %423 = vmatpush3.msra.mxu1 %v414_v26  ;;  %426 = vmatprep.mubr.msk.f32.mxu1 %vm103_vm0, %v201_v22 }
  0xf9   :  { %424 = vmatprep.subr.mxu1 %v192_v27 }
  0xfa   :  { %425 = vmatpush3.msra.mxu1 %v192_v27 }
  0xfb   :  { %427 = vmatmul.mubr.msk.f32.vlgmr.msra.gmra.mxu1 %vm103_vm0, %v202_v25 }
 0x1b7   :  { %v421_v28 = vpop.f32.mrf.mxu1 }
 0x1b8   :  { %360 = vst.msk [vmem:[#allocation8 + $0x8] sm:$0xff] %vm103_vm0, %v421_v28 }
 0x1b9   :  { %v275_v29 = vpop.f32.mrf.mxu1 }
 0x1ba   :  { %359 = vst.msk [vmem:[#allocation8] sm:$0xff] %vm103_vm0, %v275_v29 }
 0x1bb   :  { %v428_v30 = vpop.f32.mrf.mxu1 }
 0x1bc   :  { %362 = vst.msk [vmem:[#allocation8 + $0x18] sm:$0xff] %vm103_vm0, %v428_v30 }
 0x1bd   :  { %v350_v31 = vpop.f32.mrf.mxu1 }
 0x1be   :  { %361 = vst.msk [vmem:[#allocation8 + $0x10] sm:$0xff] %vm103_vm0, %v350_v31 }
 0x1bf   :  { %493 = shalt.err (!%p490_p0)
}
 0x1c0   :  { %374 = dma.vmem_to_hbm [thread:$0]  %s369_s2, 512, %s577_s3, [#allocation4], %s517_s29, %s517_s29, %s518_s30  }
 0x1c1   :  { %506 = dma.done.wait [#allocation4], 512  }
 0x1c2   :  { %507 = vsyncadd [#allocation4], 4294966784 }
 0x1c3   :  { %378 = vsyncpa [#allocation3], 1 }
 0x1c4   :  { %379 = vsyncpa [#allocation6], 1 }
 0x1c5   :  { %380 = vsyncpa [#allocation4], 1 }

</bundles_post_ra>
